<compile_context>
chip_gen: v6e
topology: v6e:2x2x1
jax: 0.10.0
libtpu: 0.0.40
codegen_flags: <defaults>
</compile_context>

<pallas_src>
import functools
import math

import numpy as np
import jax
import jax.numpy as jnp
from jax import lax
from jax.experimental import pallas as pl
from jax.experimental.pallas import tpu as pltpu


def _default_vmem_limit():
    # Generation-aware scoped-VMEM limit with headroom (v7x has only 64 MiB physical).
    try:
        cap = getattr(pltpu.get_tpu_info(), "vmem_capacity_bytes", None)
        if cap:
            return int(min(cap * 3 // 4, 100 * 1024 * 1024))
    except Exception:
        pass
    return 48 * 1024 * 1024


_VMEM_LIMIT = _default_vmem_limit()


# ----------------------------- Pallas kernels -----------------------------

def _mm_bias_kernel(x_ref, w_ref, b_ref, o_ref, *, relu):
    # bf16 @ bf16 on the MXU, f32 accumulate, fused folded-BN bias (+ ReLU), f32 epilogue.
    acc = jnp.dot(x_ref[...], w_ref[...], preferred_element_type=jnp.float32)
    acc = acc + b_ref[...]
    if relu:
        acc = jnp.maximum(acc, 0.0)
    o_ref[...] = acc.astype(o_ref.dtype)


def _mm_bias_res_kernel(x_ref, w_ref, b_ref, r_ref, o_ref, *, relu):
    # Same, plus the bottleneck residual add (in f32) before the ReLU.
    acc = jnp.dot(x_ref[...], w_ref[...], preferred_element_type=jnp.float32)
    acc = acc + b_ref[...] + r_ref[...].astype(jnp.float32)
    if relu:
        acc = jnp.maximum(acc, 0.0)
    o_ref[...] = acc.astype(o_ref.dtype)


def _bottleneck_kernel(xp_ref, mask_ref, w1_ref, b1_ref, w2_ref, b2_ref,
                       w3_ref, b3_ref, op_ref, s_ref, *, wp, gc):
    # Fused bottleneck (stride 1, identity residual) on the spatially zero-padded
    # flat grid.  xp_ref/op_ref: (G, Cout) with G = N*(H+2)*(W+2); s_ref is a VMEM
    # scratch (G, width) holding the masked conv1 output.
    #
    # conv1 (1x1) + BN shift + ReLU over every padded-grid row, border rows zeroed.
    y1 = jnp.dot(xp_ref[...], w1_ref[...], preferred_element_type=jnp.float32)
    y1 = jnp.maximum(y1 + b1_ref[...], 0.0)
    s_ref[...] = jnp.where(mask_ref[...] > 0.5, y1, 0.0).astype(s_ref.dtype)

    # conv2 (3x3, stride 1, pad 1): nine row-shifted full-slab MXU matmuls, f32 acc.
    width = w2_ref.shape[-1]
    acc = jnp.zeros((gc, width), jnp.float32)
    for i in range(3):
        for j in range(3):
            acc = acc + jnp.dot(s_ref[pl.ds(i * wp + j, gc), :], w2_ref[i, j],
                                preferred_element_type=jnp.float32)
    y2 = jnp.maximum(acc + b2_ref[...], 0.0).astype(jnp.bfloat16)

    # conv3 (1x1) + BN shift + residual + ReLU; residual = the block input rows.
    res = xp_ref[pl.ds(wp + 1, gc), :].astype(jnp.float32)
    y3 = jnp.dot(y2, w3_ref[...], preferred_element_type=jnp.float32) + b3_ref[...] + res
    op_ref[...] = jnp.zeros_like(op_ref)
    op_ref[pl.ds(wp + 1, gc), :] = jnp.maximum(y3, 0.0).astype(op_ref.dtype)


def _pool_fc_kernel(x_ref, w_ref, b_ref, o_ref):
    # x_ref: (N, HW, C) -> global average pool over HW (f32), then Linear on the MXU
    # with a lane-dense (128-wide) padded classifier output.
    pooled = jnp.mean(x_ref[...].astype(jnp.float32), axis=1)
    o_ref[...] = (jnp.dot(pooled.astype(jnp.bfloat16), w_ref[...],
                          preferred_element_type=jnp.float32) + b_ref[...])


# ----------------------------- Pallas wrappers -----------------------------

def _round_up(x, m):
    return (x + m - 1) // m * m


def _pick_tile(size, candidates):
    for c in candidates:
        if size % c == 0:
            return c
    return size


@functools.lru_cache(maxsize=None)
def _build_matmul(M, K, N, relu, has_res):
    tm = _pick_tile(M, (256, 128, 64, 32, 16, 8))
    tn = _pick_tile(N, (256, 128))
    # Guarantee >= 2 grid points so both v7x TensorCores get work.
    if (M // tm) * (N // tn) == 1:
        if N >= 256:
            tn = 128
        elif M >= 16 and (M // 2) % 8 == 0:
            tm = M // 2
    # N outermost: the (K, tn) weight slab is grid-invariant over the inner M sweep
    # (weights are fetched once per column tile even at large M).
    grid = (N // tn, M // tm)

    in_specs = [
        pl.BlockSpec((tm, K), lambda j, i: (i, 0)),
        pl.BlockSpec((K, tn), lambda j, i: (0, j)),
        pl.BlockSpec((1, tn), lambda j, i: (0, j)),
    ]
    if has_res:
        in_specs.append(pl.BlockSpec((tm, tn), lambda j, i: (i, j)))
        kernel = functools.partial(_mm_bias_res_kernel, relu=relu)
    else:
        kernel = functools.partial(_mm_bias_kernel, relu=relu)

    f = pl.pallas_call(
        kernel,
        out_shape=jax.ShapeDtypeStruct((M, N), jnp.bfloat16),
        grid=grid,
        in_specs=in_specs,
        out_specs=pl.BlockSpec((tm, tn), lambda j, i: (i, j)),
        compiler_params=pltpu.CompilerParams(
            dimension_semantics=("parallel", "parallel"),
            vmem_limit_bytes=_VMEM_LIMIT),
    )
    return jax.jit(f)


def matmul_bias_act(x2d, w2d, bias, residual=None, relu=True):
    """out = act(x2d @ w2d + bias [+ residual]); x2d/w2d/residual bf16, bias f32."""
    M, K = x2d.shape
    N = w2d.shape[1]
    Mp = _round_up(M, 8)
    if Mp != M:                                   # safety net; tile-exact for these shapes
        x2d = jnp.pad(x2d, ((0, Mp - M), (0, 0)))
        if residual is not None:
            residual = jnp.pad(residual, ((0, Mp - M), (0, 0)))
    f = _build_matmul(Mp, K, N, bool(relu), residual is not None)
    out = f(x2d, w2d, bias, residual) if residual is not None else f(x2d, w2d, bias)
    return out if Mp == M else out[:M]


@functools.lru_cache(maxsize=None)
def _build_fused_bottleneck(n, h, w, width, cout):
    hp, wp = h + 2, w + 2
    G = n * hp * wp
    gc = G - 2 * wp - 2
    kernel = functools.partial(_bottleneck_kernel, wp=wp, gc=gc)
    f = pl.pallas_call(
        kernel,
        out_shape=jax.ShapeDtypeStruct((G, cout), jnp.bfloat16),
        grid=(1,),
        in_specs=[
            pl.BlockSpec((G, cout), lambda i: (0, 0)),                    # activation
            pl.BlockSpec((G, 1), lambda i: (0, 0)),                       # interior mask
            pl.BlockSpec((cout, width), lambda i: (0, 0)),                # w1
            pl.BlockSpec((1, width), lambda i: (0, 0)),                   # b1
            pl.BlockSpec((3, 3, width, width), lambda i: (0, 0, 0, 0)),   # w2
            pl.BlockSpec((1, width), lambda i: (0, 0)),                   # b2
            pl.BlockSpec((width, cout), lambda i: (0, 0)),                # w3
            pl.BlockSpec((1, cout), lambda i: (0, 0)),                    # b3
        ],
        out_specs=pl.BlockSpec((G, cout), lambda i: (0, 0)),
        scratch_shapes=[pltpu.VMEM((G, width), jnp.bfloat16)],
        compiler_params=pltpu.CompilerParams(
            dimension_semantics=("arbitrary",),
            vmem_limit_bytes=_VMEM_LIMIT),
    )
    return jax.jit(f)


def fused_bottleneck(xp, mask, p, n, h, w):
    f = _build_fused_bottleneck(n, h, w, p['width'], p['cout'])
    return f(xp, mask,
             p['conv1']['w'], p['conv1']['b'],
             p['conv2']['w'], p['conv2']['b'],
             p['conv3']['w'], p['conv3']['b'])


@functools.lru_cache(maxsize=None)
def _interior_mask(n, h, w):
    hp, wp = h + 2, w + 2
    m = np.zeros((hp, wp), np.float32)
    m[1:1 + h, 1:1 + w] = 1.0
    flat = np.tile(m.reshape(1, hp * wp), (n, 1)).reshape(n * hp * wp, 1)
    return jnp.asarray(flat)


def pool_fc(x3, fc_w, fc_b):
    """Global average pool over HW + Linear classifier, single Pallas kernel."""
    n, hw, c = x3.shape
    ncls_p = fc_w.shape[1]
    return pl.pallas_call(
        _pool_fc_kernel,
        out_shape=jax.ShapeDtypeStruct((n, ncls_p), jnp.float32),
        grid=(1,),
        in_specs=[pl.BlockSpec((n, hw, c), lambda i: (0, 0, 0)),
                  pl.BlockSpec((c, ncls_p), lambda i: (0, 0)),
                  pl.BlockSpec((1, ncls_p), lambda i: (0, 0))],
        out_specs=pl.BlockSpec((n, ncls_p), lambda i: (0, 0)),
        compiler_params=pltpu.CompilerParams(
            dimension_semantics=("arbitrary",),
            vmem_limit_bytes=_VMEM_LIMIT),
    )(x3, fc_w, fc_b)


# ----------------------------- glue (im2col, pooling) -----------------------------

def _im2col(x, kh, kw, stride, pad):
    """x: NHWC (bf16) -> patches (N*Ho*Wo, kh*kw*C).  Only used for the stem and the
    four strided / first-of-stage 3x3 convs; everything else is in-kernel."""
    n, h, w, c = x.shape
    if pad > 0:
        x = jnp.pad(x, ((0, 0), (pad, pad), (pad, pad), (0, 0)))
    hp, wp = h + 2 * pad, w + 2 * pad
    ho = (hp - kh) // stride + 1
    wo = (wp - kw) // stride + 1
    cols = []
    for i in range(kh):
        for j in range(kw):
            cols.append(x[:, i:i + stride * (ho - 1) + 1:stride,
                           j:j + stride * (wo - 1) + 1:stride, :])
    patches = jnp.stack(cols, axis=3)          # (n, ho, wo, kh*kw, c)
    return patches.reshape(n * ho * wo, kh * kw * c), (n, ho, wo)


def conv_bn(x, p, stride, pad, relu, residual=None):
    """Conv2d (no bias) + folded BatchNorm (+residual) (+ReLU); hot path in Pallas."""
    kh, kw, cin, cout = p['kh'], p['kw'], p['cin'], p['cout']
    n = x.shape[0]
    if kh == 1 and kw == 1:
        # TODO(synk): the stride-2 subsample of the 3 downsample projections is still
        # an XLA strided slice, not an in-kernel strided load.
        xs = x[:, ::stride, ::stride, :] if stride > 1 else x   # no patch expansion
        ho, wo = xs.shape[1], xs.shape[2]
        x2d = xs.reshape(n * ho * wo, cin)
    else:
        x2d, (_, ho, wo) = _im2col(x, kh, kw, stride, pad)
    res2d = residual.reshape(n * ho * wo, cout) if residual is not None else None
    out2d = matmul_bias_act(x2d, p['w'], p['b'], residual=res2d, relu=relu)
    return out2d.reshape(n, ho, wo, cout)


def max_pool_3x3_s2(x):
    # TODO(synk): max-pool is window glue; done with lax.reduce_window, not a Pallas kernel.
    return lax.reduce_window(x, jnp.asarray(-jnp.inf, x.dtype), lax.max,
                             window_dimensions=(1, 3, 3, 1),
                             window_strides=(1, 2, 2, 1),
                             padding=((0, 0), (1, 1), (1, 1), (0, 0)))


# ----------------------------- ResNet101 definition -----------------------------

def _kaiming_conv(rng, cout, cin, k):
    fan_out = cout * k * k                      # torchvision: kaiming_normal_(fan_out, relu)
    std = math.sqrt(2.0 / fan_out)
    return rng.standard_normal((cout, cin, k, k), dtype=np.float32) * std


def _bn_scale_shift(c, eps=1e-5):
    gamma = np.ones((c,), np.float32)
    beta = np.zeros((c,), np.float32)
    mean = np.zeros((c,), np.float32)
    var = np.ones((c,), np.float32)
    scale = gamma / np.sqrt(var + eps)
    shift = beta - mean * scale
    return scale, shift


def _conv_bn_init(rng, cout, cin, k, cin_pad=None, cout_pad=None, layout='2d'):
    # Precompute, ONCE: (Cout,Cin,kh,kw) -> bf16 weight with the BN scale folded into
    # the (real) weight columns; padded rows/columns are exact zeros so lane-padding
    # never changes the math.  Only the BN shift remains as an f32 bias row.
    cin_p = cin_pad if cin_pad is not None else cin
    cout_p = cout_pad if cout_pad is not None else cout
    w = _kaiming_conv(rng, cout, cin, k)
    scale, shift = _bn_scale_shift(cout)
    w4 = np.zeros((k, k, cin_p, cout_p), np.float32)
    w4[:, :, :cin, :cout] = np.transpose(w, (2, 3, 1, 0)) * scale[None, None, None, :]
    b = np.zeros((1, cout_p), np.float32)
    b[0, :cout] = shift
    w_arr = (jnp.asarray(w4, jnp.bfloat16) if layout == '4d'
             else jnp.asarray(w4.reshape(k * k * cin_p, cout_p), jnp.bfloat16))
    return {'w': w_arr, 'b': jnp.asarray(b, jnp.float32),
            'kh': k, 'kw': k, 'cin': cin_p, 'cout': cout_p}


def init_resnet101_params(num_classes=10, seed=0):
    rng = np.random.default_rng(seed)
    # Stem: Cin 3 -> 8 (aligned K = 7*7*8) and Cout 64 -> 128 (lane-dense stores).
    params = {'stem': _conv_bn_init(rng, 64, 3, 7, cin_pad=8, cout_pad=128)}
    layer_cfg = [(64, 3, 1), (128, 4, 2), (256, 23, 2), (512, 3, 2)]   # ResNet-101
    in_real, in_pad = 64, 128
    for li, (width, nblocks, stride) in enumerate(layer_cfg, start=1):
        width_p = max(width, 128)               # lane-dense: 64-wide layers padded to 128
        out_ch = width * 4
        blocks = []
        for b in range(nblocks):
            cin_r, cin_p = (in_real, in_pad) if b == 0 else (out_ch, out_ch)
            fused = b > 0                       # non-first blocks run the fused kernel
            blk = {'stride': stride if b == 0 else 1,
                   'width': width_p, 'cout': out_ch,
                   'conv1': _conv_bn_init(rng, width, cin_r, 1,
                                          cin_pad=cin_p, cout_pad=width_p),
                   'conv2': _conv_bn_init(rng, width, width, 3,
                                          cin_pad=width_p, cout_pad=width_p,
                                          layout='4d' if fused else '2d'),
                   'conv3': _conv_bn_init(rng, out_ch, width, 1, cin_pad=width_p)}
            if b == 0:  # downsample projection (stride and/or channel change)
                blk['down'] = _conv_bn_init(rng, out_ch, cin_r, 1, cin_pad=cin_p)
            blocks.append(blk)
        params[f'layer{li}'] = blocks
        in_real, in_pad = out_ch, out_ch
    # classifier (kaiming_normal_ as in the module, bias 0), padded to a lane-dense
    # 128-wide output at init.
    ncls_p = max(128, _round_up(num_classes, 128))
    fc_std = math.sqrt(2.0 / 2048.0)
    fc_w = np.zeros((2048, ncls_p), np.float32)
    fc_w[:, :num_classes] = rng.standard_normal((2048, num_classes),
                                                dtype=np.float32) * fc_std
    params['fc_w'] = jnp.asarray(fc_w, jnp.bfloat16)
    params['fc_b'] = jnp.zeros((1, ncls_p), jnp.float32)
    params['num_classes'] = num_classes
    return params


def bottleneck_unfused(x, p):
    # First block of each stage: strided 3x3 + downsample projection (im2col path).
    s = p['stride']
    out = conv_bn(x, p['conv1'], stride=1, pad=0, relu=True)
    out = conv_bn(out, p['conv2'], stride=s, pad=1, relu=True)
    identity = conv_bn(x, p['down'], stride=s, pad=0, relu=False) if 'down' in p else x
    # conv3 + bn3 + residual add + relu fused in one Pallas kernel
    return conv_bn(out, p['conv3'], stride=1, pad=0, relu=True, residual=identity)


def resnet101_forward(params, x_nchw):
    x = jnp.transpose(x_nchw, (0, 2, 3, 1)).astype(jnp.bfloat16)   # NCHW -> NHWC, bf16
    x = jnp.pad(x, ((0, 0), (0, 0), (0, 0), (0, 8 - x.shape[-1])))  # Cin 3 -> 8
    x = conv_bn(x, params['stem'], stride=2, pad=3, relu=True)
    x = max_pool_3x3_s2(x)
    for li in range(1, 5):
        blocks = params[f'layer{li}']
        x = bottleneck_unfused(x, blocks[0])
        if len(blocks) > 1:
            n, h, w, c = x.shape
            hp, wp = h + 2, w + 2
            # one tiny spatial zero-pad per stage; the fused blocks then keep the
            # activation on this padded flat grid (no per-block HBM layout work).
            xp = jnp.pad(x, ((0, 0), (1, 1), (1, 1), (0, 0))).reshape(n * hp * wp, c)
            mask = _interior_mask(n, h, w)
            for blk in blocks[1:]:
                xp = fused_bottleneck(xp, mask, blk, n, h, w)
            x = xp.reshape(n, hp, wp, c)[:, 1:1 + h, 1:1 + w, :]
    n, h, w, c = x.shape
    logits_p = pool_fc(x.reshape(n, h * w, c), params['fc_w'], params['fc_b'])
    # dropout_p=None in the module default -> dropout is identity.
    return logits_p[:, :params['num_classes']]


# ----------------------------- main -----------------------------

if __name__ == "__main__":
    num_classes = 10
    params = init_resnet101_params(num_classes=num_classes, seed=0)

    key = jax.random.PRNGKey(0)
    x = jax.random.normal(key, (2, 3, 64, 64), jnp.float32)   # PyTorch-style NCHW input

    logits = resnet101_forward(params, x)
    logits = jax.block_until_ready(logits)

    assert logits.shape == (2, num_classes), logits.shape
    assert bool(jnp.all(jnp.isfinite(logits)))
    print("KERNEL_OK")
</pallas_src>

<mosaic_0001>
module attributes {stable_mosaic.version = 11 : i64} {
  func.func @_mm_bias_kernel(%arg0: i32, %arg1: i32, %arg2: memref<256x392xbf16, #tpu.memory_space<vmem>>, %arg3: memref<392x128xbf16, #tpu.memory_space<vmem>>, %arg4: memref<1x128xf32, #tpu.memory_space<vmem>>, %arg5: memref<256x128xbf16, #tpu.memory_space<vmem>>) attributes {dimension_semantics = [#tpu.dimension_semantics<parallel>, #tpu.dimension_semantics<parallel>], iteration_bounds = array<i64: 1, 8>, scalar_prefetch = 0 : i64, scratch_operands = 0 : i64, tpu.core_type = #tpu.core_type<tc>, window_params = [{transform_indices = @transform_0, window_bounds = array<i64: 256, 392>}, {transform_indices = @transform_1, window_bounds = array<i64: 392, 128>}, {transform_indices = @transform_2, window_bounds = array<i64: 1, 128>}, {transform_indices = @transform_3, window_bounds = array<i64: 256, 128>}]} {
    %c0 = arith.constant 0 : index
    %c0_0 = arith.constant 0 : index
    %0 = vector.load %arg2[%c0, %c0_0] : memref<256x392xbf16, #tpu.memory_space<vmem>>, vector<256x392xbf16>
    %c0_1 = arith.constant 0 : index
    %c0_2 = arith.constant 0 : index
    %1 = vector.load %arg3[%c0_1, %c0_2] : memref<392x128xbf16, #tpu.memory_space<vmem>>, vector<392x128xbf16>
    %cst = arith.constant dense<0.000000e+00> : vector<256x128xf32>
    %2 = tpu.matmul %0, %1, %cst {dimension_numbers = #tpu.dot_dimension_numbers<[1], [0], [0], [1], [0, 0, 1, 1], [], []>} : vector<256x392xbf16>, vector<392x128xbf16>, vector<256x128xf32> -> vector<256x128xf32>
    %c0_3 = arith.constant 0 : index
    %c0_4 = arith.constant 0 : index
    %3 = vector.load %arg4[%c0_3, %c0_4] : memref<1x128xf32, #tpu.memory_space<vmem>>, vector<1x128xf32>
    %4 = vector.broadcast %3 : vector<1x128xf32> to vector<256x128xf32>
    %5 = arith.addf %2, %4 : vector<256x128xf32>
    %cst_5 = arith.constant 0.000000e+00 : f32
    %6 = vector.broadcast %cst_5 : f32 to vector<256x128xf32>
    %7 = arith.maximumf %5, %6 : vector<256x128xf32>
    %8 = arith.truncf %7 : vector<256x128xf32> to vector<256x128xbf16>
    %c0_6 = arith.constant 0 : index
    %c0_7 = arith.constant 0 : index
    %9 = vector.load %arg5[%c0_6, %c0_7] : memref<256x128xbf16, #tpu.memory_space<vmem>>, vector<256x128xbf16>
    tpu.vector_store %arg5[%c0_6, %c0_7], %8 {strides = array<i32>} : memref<256x128xbf16, #tpu.memory_space<vmem>>, vector<256x128xbf16>,
    return
  }
  func.func @transform_0(%arg0: i32, %arg1: i32) -> (i32, i32) {
    %c0_i32 = arith.constant 0 : i32
    %c0_i32_0 = arith.constant 0 : i32
    return %arg1, %c0_i32 : i32, i32
  }
  func.func @transform_1(%arg0: i32, %arg1: i32) -> (i32, i32) {
    %c0_i32 = arith.constant 0 : i32
    %c0_i32_0 = arith.constant 0 : i32
    return %c0_i32, %arg0 : i32, i32
  }
  func.func @transform_2(%arg0: i32, %arg1: i32) -> (i32, i32) {
    %c0_i32 = arith.constant 0 : i32
    %c0_i32_0 = arith.constant 0 : i32
    return %c0_i32, %arg0 : i32, i32
  }
  func.func @transform_3(%arg0: i32, %arg1: i32) -> (i32, i32) {
    %c0_i32 = arith.constant 0 : i32
    return %arg1, %arg0 : i32, i32
  }
}

</mosaic_0001>

<bundles_post_ra>
// kernel: tpu_custom_call.1
= control target key start
LH: loop header
LB: loop body
LE: loop exit
PB: predicated region body
PF: predicated region fallthrough
CT: control target
= control target key end

     0   :  { %8 = vsyncpa [#allocation3], 0  ;;  %s2488_s0 = inlined_call_operand.vmem [shape: bf16[2048,392], index: 0, kind: input, shape index: {}]   ;;  %s2489_s1 = inlined_call_operand.vmem [shape: bf16[392,128], index: 1, kind: input, shape index: {}]   ;;  %s2490_s2 = inlined_call_operand.vmem [shape: f32[1,128], index: 2, kind: input, shape index: {}]   ;;  %s2491_s3 = inlined_call_operand.hbm [shape: bf16[2048,128], index: 3, kind: output, shape index: {}]  }
   0x1   :  { %10 = vsyncpa [#allocation3 + $0x1], 0  ;;  %s2149_s12 = smov 0   ;;  %s2151_s13 = smov 0  }
   0x2   :  { %s2153_s14 = smov 0   ;;  %s2155_s15 = smov 0  }
   0x3   :  { %s2157_s16 = smov 0   ;;  %s2159_s17 = smov 0  }
   0x4 LB: > { %s1473_s18 = sadd.s32 4294967295, %s2123_s17   ;;  %s1474_s19 = sadd.s32 4294967294, %s2123_s17   ;;  %s2123_s17 = sphi %s2159_s17, %s16_s17   ;;  %s2119_s16 = sphi %s2157_s16, %s2498_s16   ;;  %s2115_s15 = sphi %s2155_s15, %s2497_s15   ;;  %s2111_s14 = sphi %s2153_s14, %s2496_s14   ;;  %s2107_s13 = sphi %s2151_s13, %s2495_s13   ;;  %s2103_s12 = sphi %s2149_s12, %s2494_s12  }
   0x5   : > { %s25_s20 = sadd.s32 1, %s2119_s16  ;;  %s115_s21 = sadd.s32 1, %s2111_s14 }
   0x6   : > { %p26_p0 = scmp.ge.s32.totalorder %s25_s20, 8  ;;  %p125_p1 = scmp.ne.s32.totalorder %s2111_s14, %s2107_s13 }
   0x7   : > { %p126_p2 = scmp.eq.s32.totalorder %s1473_s18, 7  ;;  %p131_p3 = scmp.ne.s32.totalorder %s2107_s13, %s2103_s12 }
   0x8   : > { %s2500_s20 = smov (%p26_p0, %s25_s20), 0  ;;  %p132_p5 = scmp.eq.s32.totalorder %s1474_s19, 7 }
   0x9   : > { %p2189_p4 = por %p126_p2, %p125_p1  ;;  %s110_s23 = ssub.s32 %s2119_s16, %s2500_s20 }
   0xa   : > { %p1479_p6 = scmp.ge.s32.totalorder %s2123_s17, 1  ;;  %p113_p7 = scmp.eq.s32.totalorder %s110_s23, 0 }
   0xb   : > { %p2196_p8 = por %p132_p5, %p131_p3  ;;  %p173_p9 = scmp.lt.s32.totalorder %s2123_s17, 9 }
   0xc   : > { %s2202_s25 = scalar_select %p113_p7, %s2111_s14, %s115_s21  }
   0xd   : > { %p174_p10 = pnand %p1479_p6, %p173_p9 }
   0xe   : > { %s1481_s27 = sshll.u32 (!%p174_p10), %s2115_s15, 5  ;;  %s202_s6 = sand.u32 (!%p174_p10), 1, %s2107_s13  }
   0xf   : > { %177 = sbr.rel (%p174_p10) target bundleno = 397 (0x18d), region = 32  ;;  %p206_p11 = scmp.lt.s32.totalorder (!%p174_p10), %s1481_s27, 255 }
  0x10   : > { %s1480_s7 = sshll.u32 (!%p174_p10), %s202_s6, 7  ;;  %s2443_s19 = scalar_lea.sflag (!%p174_p10), [#allocation3], %s202_s6 }
  0x14   : > { %v1926_v0 = vld [vmem:[%s2489_s1 + $0x78] sm:$0xff]   ;;  %v2125_v1 = vmov 0   ;;  %v1929_v4 = vld [vmem:[%s2489_s1 + $0x70] sm:$0xff]   ;;  %v1932_v7 = vld [vmem:[%s2489_s1 + $0x68] sm:$0xff]   ;;  %s2502_s27 = smov (!%p206_p11, %s1481_s27), 255  ;;  %vm792_vm0 = vcmask 64512  }
  0x15   : > { %1006 = vmatprep.subr.bf16.mxu1 %v2125_v1  ;;  %v1927_v2 = vld [vmem:[%s2489_s1 + $0xb8] sm:$0xff]   ;;  %1756 = vmatprep.subr.bf16.mxu0 %v1926_v0  ;;  %v1930_v5 = vld [vmem:[%s2489_s1 + $0xb0] sm:$0xff]   ;;  %v1933_v8 = vld [vmem:[%s2489_s1 + $0xa8] sm:$0xff]   ;;  %s1627_s28 = sshll.u32 %s2502_s27, 4  ;;  %vm841_vm1 = vcmask 1043456   ;;  %s1660_s27 = sshll.u32 %s2115_s15, 11 }
  0x16   : > { %v1928_v3 = vld [vmem:[%s2489_s1 + $0x38] sm:$0xff]   ;;  %1007 = vmatpush1.bf16.msra.mxu1 %v1927_v2  ;;  %v1931_v6 = vld [vmem:[%s2489_s1 + $0x30] sm:$0xff]   ;;  %v1934_v9 = vld [vmem:[%s2489_s1 + $0x28] sm:$0xff]   ;;  %s2271_s8 = scalar_lea.vmem %s2488_s0, %s1627_s28  ;;  %s2436_s18 = scalar_lea.hbm %s2491_s3, %s1660_s27 }
  0x17   : > { %1757 = vmatpush3.bf16.msra.mxu0 %v1928_v3  ;;  %1008 = vmatprep.subr.bf16.mxu1 %v2125_v1  ;;  %v1935_v10 = vld [vmem:[%s2489_s1 + $0x60] sm:$0xff]   ;;  %v1938_v13 = vld [vmem:[%s2489_s1 + $0x58] sm:$0xff]   ;;  %v1941_v16 = vld [vmem:[%s2489_s1 + $0x50] sm:$0xff]   ;;  %s2126_s15 = smov [#allocation2]  }
  0x18   : > { %1758 = vmatprep.subr.bf16.mxu0 %v1929_v4  ;;  %v1936_v11 = vld [vmem:[%s2489_s1 + $0xa0] sm:$0xff]   ;;  %v1939_v14 = vld [vmem:[%s2489_s1 + $0x98] sm:$0xff]   ;;  %v1942_v17 = vld [vmem:[%s2489_s1 + $0x90] sm:$0xff]   ;;  %s2051_s23 = sshll.u32 %s2126_s15, 4  ;;  %s2052_s23 = int_to_ptr.vmem [resolvable:$false] %s2051_s23 }
  0x19   : > { %v1937_v12 = vld [vmem:[%s2489_s1 + $0x20] sm:$0xff]   ;;  %v1940_v15 = vld [vmem:[%s2489_s1 + $0x18] sm:$0xff]   ;;  %v1943_v18 = vld [vmem:[%s2489_s1 + $0x10] sm:$0xff]   ;;  %s2053_s26 = scalar_lea.vmem %s2052_s23, 4096 }
  0x1a   : > { %1009 = vmatpush1.bf16.msra.mxu1 %v1930_v5  ;;  %v1944_v19 = vld [vmem:[%s2489_s1 + $0x48] sm:$0xff]   ;;  %v1947_v22 = vld [vmem:[%s2489_s1 + $0x40] sm:$0xff]  }
  0x1b   : > { %1759 = vmatpush3.bf16.msra.mxu0 %v1931_v6  ;;  %1010 = vmatprep.subr.bf16.mxu1 %v2125_v1  ;;  %v1945_v20 = vld [vmem:[%s2489_s1 + $0x88] sm:$0xff]   ;;  %v1952_v23 = vld [vmem:[%s2271_s8 + $0x4] ss:$16 sps:$4 sm:$0xff]   ;;  %v1953_v27 = vld [vmem:[%s2489_s1 + $0xc0] ss:$0 sps:$4 sm:$0xff]  }
  0x1c   : > { %1760 = vmatprep.subr.bf16.mxu0 %v1932_v7  ;;  %v1946_v21 = vld [vmem:[%s2489_s1 + $0x8] sm:$0xff]   ;;  %v1948_v24 = vld [vmem:[%s2489_s1 + $0x80] sm:$0xff]   ;;  %877 = vmatprep.mubr.bf16.mxu0 %v1952_v23  ;;  %v843_v29 = vsel %vm841_vm1, %v1953_v27, 0 }
  0x1d   : > { %v1956_v25 = vld [vmem:[%s2271_s8 + $0xc] ss:$16 sps:$4 sm:$0xff]   ;;  %v1949_v26 = vld [vmem:[%s2489_s1] sm:$0xff]   ;;  %v1954_v31 = vld [vmem:[%s2271_s8 + $0x8] ss:$16 sps:$4 sm:$0xff]  }
  0x1e   : > { %1011 = vmatpush1.bf16.msra.mxu1 %v1933_v8  ;;  %1574 = vmatprep.mubr.msk.bf16.mxu1 %vm792_vm0, %v1956_v25  ;;  %v1950_v28 = vld [vmem:[%s2271_s8] ss:$16 sps:$4 sm:$0xff]   ;;  %v1957_v30 = vld [vmem:[%s2271_s8 + $0x24] ss:$16 sps:$4 sm:$0xff]   ;;  %v1960_v32 = vld [vmem:[%s2271_s8 + $0x2c] ss:$16 sps:$4 sm:$0xff]  }
  0x1f   : > { %1761 = vmatpush3.bf16.msra.mxu0 %v1934_v9  ;;  %1012 = vmatprep.subr.bf16.mxu1 %v2125_v1  ;;  %v1959_v33 = vld [vmem:[%s2271_s8 + $0x20] ss:$16 sps:$4 sm:$0xff]   ;;  %v1963_v34 = vld [vmem:[%s2271_s8 + $0x44] ss:$16 sps:$4 sm:$0xff]   ;;  %v1962_v35 = vld [vmem:[%s2271_s8 + $0x28] ss:$16 sps:$4 sm:$0xff]  }
  0x20   : > { %1762 = vmatprep.subr.bf16.mxu0 %v1935_v10  ;;  %v1966_v36 = vld [vmem:[%s2271_s8 + $0x4c] ss:$16 sps:$4 sm:$0xff]   ;;  %v1965_v37 = vld [vmem:[%s2271_s8 + $0x40] ss:$16 sps:$4 sm:$0xff]   ;;  %v1969_v38 = vld [vmem:[%s2271_s8 + $0x64] ss:$16 sps:$4 sm:$0xff]  }
  0x21   : > { %v1968_v39 = vld [vmem:[%s2271_s8 + $0x48] ss:$16 sps:$4 sm:$0xff]   ;;  %v1972_v40 = vld [vmem:[%s2271_s8 + $0x6c] ss:$16 sps:$4 sm:$0xff]   ;;  %v1971_v41 = vld [vmem:[%s2271_s8 + $0x60] ss:$16 sps:$4 sm:$0xff]  }
  0x22   : > { %1013 = vmatpush1.bf16.msra.mxu1 %v1936_v11  ;;  %v1975_v42 = vld [vmem:[%s2271_s8 + $0x84] ss:$16 sps:$4 sm:$0xff]   ;;  %v1974_v43 = vld [vmem:[%s2271_s8 + $0x68] ss:$16 sps:$4 sm:$0xff]   ;;  %v1978_v44 = vld [vmem:[%s2271_s8 + $0x8c] ss:$16 sps:$4 sm:$0xff]  }
  0x23   : > { %1763 = vmatpush3.bf16.msra.mxu0 %v1937_v12  ;;  %1014 = vmatprep.subr.bf16.mxu1 %v2125_v1  ;;  %v1977_v45 = vld [vmem:[%s2271_s8 + $0x80] ss:$16 sps:$4 sm:$0xff]   ;;  %v1981_v46 = vld [vmem:[%s2271_s8 + $0xa4] ss:$16 sps:$4 sm:$0xff]   ;;  %v1980_v47 = vld [vmem:[%s2271_s8 + $0x88] ss:$16 sps:$4 sm:$0xff]  }
  0x24   : > { %1764 = vmatprep.subr.bf16.mxu0 %v1938_v13  ;;  %v1984_v48 = vld [vmem:[%s2271_s8 + $0xac] ss:$16 sps:$4 sm:$0xff]   ;;  %v1983_v49 = vld [vmem:[%s2271_s8 + $0xa0] ss:$16 sps:$4 sm:$0xff]   ;;  %v1987_v50 = vld [vmem:[%s2271_s8 + $0xc4] ss:$16 sps:$4 sm:$0xff]  }
  0x25   : > { %v1986_v51 = vld [vmem:[%s2271_s8 + $0xa8] ss:$16 sps:$4 sm:$0xff]   ;;  %v1990_v52 = vld [vmem:[%s2271_s8 + $0xcc] ss:$16 sps:$4 sm:$0xff]   ;;  %v1989_v53 = vld [vmem:[%s2271_s8 + $0xc0] ss:$16 sps:$4 sm:$0xff]  }
  0x26   : > { %1015 = vmatpush1.bf16.msra.mxu1 %v1939_v14  ;;  %v1993_v54 = vld [vmem:[%s2271_s8 + $0xe4] ss:$16 sps:$4 sm:$0xff]   ;;  %v1992_v55 = vld [vmem:[%s2271_s8 + $0xc8] ss:$16 sps:$4 sm:$0xff]   ;;  %v1996_v56 = vld [vmem:[%s2271_s8 + $0xec] ss:$16 sps:$4 sm:$0xff]  }
  0x27   : > { %1765 = vmatpush3.bf16.msra.mxu0 %v1940_v15  ;;  %1016 = vmatprep.subr.bf16.mxu1 %v2125_v1  ;;  %v1995_v57 = vld [vmem:[%s2271_s8 + $0xe0] ss:$16 sps:$4 sm:$0xff]   ;;  %v1999_v58 = vld [vmem:[%s2271_s8 + $0x104] ss:$16 sps:$4 sm:$0xff]   ;;  %v1998_v59 = vld [vmem:[%s2271_s8 + $0xe8] ss:$16 sps:$4 sm:$0xff]  }
  0x28   : > { %1766 = vmatprep.subr.bf16.mxu0 %v1941_v16  ;;  %v2002_v60 = vld [vmem:[%s2271_s8 + $0x10c] ss:$16 sps:$4 sm:$0xff]   ;;  %v2001_v61 = vld [vmem:[%s2271_s8 + $0x100] ss:$16 sps:$4 sm:$0xff]   ;;  %v2005_v62 = vld [vmem:[%s2271_s8 + $0x124] ss:$16 sps:$4 sm:$0xff]  }
  0x29   : > { %v2004_v63 = vld [vmem:[%s2271_s8 + $0x108] ss:$16 sps:$4 sm:$0xff]   ;;  %v2008_v0 = vld [vmem:[%s2271_s8 + $0x12c] ss:$16 sps:$4 sm:$0xff]   ;;  %v2011_v2 = vld [vmem:[%s2271_s8 + $0x144] ss:$16 sps:$4 sm:$0xff]  }
  0x2a   : > { %1017 = vmatpush1.bf16.msra.mxu1 %v1942_v17  ;;  %v2010_v3 = vld [vmem:[%s2271_s8 + $0x128] ss:$16 sps:$4 sm:$0xff]   ;;  %v2014_v4 = vld [vmem:[%s2271_s8 + $0x14c] ss:$16 sps:$4 sm:$0xff]   ;;  %v2013_v5 = vld [vmem:[%s2271_s8 + $0x140] ss:$16 sps:$4 sm:$0xff]  }
  0x2b   : > { %1767 = vmatpush3.bf16.msra.mxu0 %v1943_v18  ;;  %1018 = vmatprep.subr.bf16.mxu1 %v2125_v1  ;;  %v2017_v6 = vld [vmem:[%s2271_s8 + $0x164] ss:$16 sps:$4 sm:$0xff]   ;;  %v2016_v7 = vld [vmem:[%s2271_s8 + $0x148] ss:$16 sps:$4 sm:$0xff]   ;;  %v2020_v8 = vld [vmem:[%s2271_s8 + $0x16c] ss:$16 sps:$4 sm:$0xff]  }
  0x2c   : > { %1768 = vmatprep.subr.bf16.mxu0 %v1944_v19  ;;  %v2019_v9 = vld [vmem:[%s2271_s8 + $0x160] ss:$16 sps:$4 sm:$0xff]   ;;  %v2023_v10 = vld [vmem:[%s2271_s8 + $0x184] ss:$16 sps:$4 sm:$0xff]   ;;  %v2022_v11 = vld [vmem:[%s2271_s8 + $0x168] ss:$16 sps:$4 sm:$0xff]  }
  0x2d   : > { %v2026_v12 = vld [vmem:[%s2271_s8 + $0x18c] ss:$16 sps:$4 sm:$0xff]   ;;  %v2025_v13 = vld [vmem:[%s2271_s8 + $0x180] ss:$16 sps:$4 sm:$0xff]   ;;  %v2029_v14 = vld [vmem:[%s2271_s8 + $0x1a4] ss:$16 sps:$4 sm:$0xff]  }
  0x2e   : > { %1019 = vmatpush1.bf16.msra.mxu1 %v1945_v20  ;;  %v2028_v15 = vld [vmem:[%s2271_s8 + $0x188] ss:$16 sps:$4 sm:$0xff]   ;;  %v2032_v16 = vld [vmem:[%s2271_s8 + $0x1ac] ss:$16 sps:$4 sm:$0xff]   ;;  %v2031_v17 = vld [vmem:[%s2271_s8 + $0x1a0] ss:$16 sps:$4 sm:$0xff]  }
  0x2f   : > { %1769 = vmatpush3.bf16.msra.mxu0 %v1946_v21  ;;  %1020 = vmatprep.subr.bf16.mxu1 %v2125_v1  ;;  %v2035_v18 = vld [vmem:[%s2271_s8 + $0x1c4] ss:$16 sps:$4 sm:$0xff]   ;;  %v2034_v19 = vld [vmem:[%s2271_s8 + $0x1a8] ss:$16 sps:$4 sm:$0xff]   ;;  %v2038_v20 = vld [vmem:[%s2271_s8 + $0x1cc] ss:$16 sps:$4 sm:$0xff]  }
  0x30   : > { %1770 = vmatprep.subr.bf16.mxu0 %v1947_v22  ;;  %v2037_v21 = vld [vmem:[%s2271_s8 + $0x1c0] ss:$16 sps:$4 sm:$0xff]   ;;  %v2041_v22 = vld [vmem:[%s2271_s8 + $0x1e4] ss:$16 sps:$4 sm:$0xff]   ;;  %v2040_v23 = vld [vmem:[%s2271_s8 + $0x1c8] ss:$16 sps:$4 sm:$0xff]  }
  0x31   : > { %v2043_v25 = vld [vmem:[%s2271_s8 + $0x1e0] ss:$16 sps:$4 sm:$0xff]  }
  0x32   : > { %1021 = vmatpush1.bf16.msra.mxu1 %v1948_v24  ;;  %v2044_v24 = vld [vmem:[%s2271_s8 + $0x1ec] ss:$16 sps:$4 sm:$0xff]  }
  0x33   : > { %1771 = vmatpush3.bf16.msra.mxu0 %v1949_v26  ;;  %1036 = vmatprep.subr.bf16.mxu1 %v2125_v1  ;;  %v2007_v1 = vld [vmem:[%s2271_s8 + $0x120] ss:$16 sps:$4 sm:$0xff]   ;;  %v2046_v26 = vld [vmem:[%s2271_s8 + $0x1e8] ss:$16 sps:$4 sm:$0xff]   ;;  %s2385_s8 = scalar_lea.vmem [#allocation2], %s1480_s7 }
  0x34   : > { %s1374_s9 = sshll.u32 %s2385_s8, 4  ;;  %s2438_s9 = int_to_ptr.vmem [resolvable:$true] %s1374_s9 }
  0x35   : > { %s2047_s21 = scalar_lea.vmem %s2438_s9, 2048  ;;  %p2054_p1 = scmp.lt.s32.totalorder %s2438_s9, %s2052_s23 }
  0x36   : > { %878 = vmatmul.mubr.bf16.vlgmr.msra.gmra.mxu0 %v1950_v28  ;;  %1037 = vmatpush2.bf16.msra.mxu1 %v843_v29  ;;  %v2377_v29 = vld [vmem:[%s2490_s2] ss:$0 sm:$0xff]  ;;  %p2048_p12 = scmp.ne.s32.totalorder %s2438_s9, %s2047_s21  ;;  %p2055_p2 = scmp.lt.s32.totalorder %s2053_s26, %s2047_s21 }
  0x37   : > { %885 = vmatprep.mubr.bf16.mxu0 %v1957_v30 }
  0x38   : > { %p2049_p13 = pnand %p2048_p12, %p2189_p4  ;;  %p2056_p3 = por %p2055_p2, %p2054_p1 }
  0x39   : > { %1039 = vmatmul.mubr.bf16.vlgmr.msra.gmra.mxu1 %v1954_v31 }
  0x3a   : > { %1575 = vmatprep.mubr.msk.bf16.mxu1 %vm792_vm0, %v1960_v32  ;;  %p2050_p0 = pneg %p2049_p13 }
  0x3c   : > { %p2057_p5 = pnand %p2056_p3, %p2050_p0 }
  0x3e   : > { %886 = vmatmul.mubr.bf16.gmra.mxu0 %v1959_v33 }
  0x3f   : > { %893 = vmatprep.mubr.bf16.mxu0 %v1963_v34 }
  0x41   : > { %1047 = vmatmul.mubr.bf16.gmra.mxu1 %v1962_v35 }
  0x42   : > { %1576 = vmatprep.mubr.msk.bf16.mxu1 %vm792_vm0, %v1966_v36 }
  0x46   : > { %894 = vmatmul.mubr.bf16.gmra.mxu0 %v1965_v37 }
  0x47   : > { %901 = vmatprep.mubr.bf16.mxu0 %v1969_v38 }
  0x49   : > { %1055 = vmatmul.mubr.bf16.gmra.mxu1 %v1968_v39 }
  0x4a   : > { %1577 = vmatprep.mubr.msk.bf16.mxu1 %vm792_vm0, %v1972_v40 }
  0x4e   : > { %902 = vmatmul.mubr.bf16.gmra.mxu0 %v1971_v41 }
  0x4f   : > { %909 = vmatprep.mubr.bf16.mxu0 %v1975_v42 }
  0x51   : > { %1063 = vmatmul.mubr.bf16.gmra.mxu1 %v1974_v43 }
  0x52   : > { %1578 = vmatprep.mubr.msk.bf16.mxu1 %vm792_vm0, %v1978_v44 }
  0x56   : > { %910 = vmatmul.mubr.bf16.gmra.mxu0 %v1977_v45 }
  0x57   : > { %917 = vmatprep.mubr.bf16.mxu0 %v1981_v46 }
  0x59   : > { %1071 = vmatmul.mubr.bf16.gmra.mxu1 %v1980_v47 }
  0x5a   : > { %1579 = vmatprep.mubr.msk.bf16.mxu1 %vm792_vm0, %v1984_v48 }
  0x5e   : > { %918 = vmatmul.mubr.bf16.gmra.mxu0 %v1983_v49 }
  0x5f   : > { %925 = vmatprep.mubr.bf16.mxu0 %v1987_v50 }
  0x61   : > { %1079 = vmatmul.mubr.bf16.gmra.mxu1 %v1986_v51 }
  0x62   : > { %1580 = vmatprep.mubr.msk.bf16.mxu1 %vm792_vm0, %v1990_v52 }
  0x66   : > { %926 = vmatmul.mubr.bf16.gmra.mxu0 %v1989_v53 }
  0x67   : > { %933 = vmatprep.mubr.bf16.mxu0 %v1993_v54 }
  0x69   : > { %1087 = vmatmul.mubr.bf16.gmra.mxu1 %v1992_v55 }
  0x6a   : > { %1581 = vmatprep.mubr.msk.bf16.mxu1 %vm792_vm0, %v1996_v56 }
  0x6e   : > { %934 = vmatmul.mubr.bf16.gmra.mxu0 %v1995_v57 }
  0x6f   : > { %941 = vmatprep.mubr.bf16.mxu0 %v1999_v58 }
  0x71   : > { %1095 = vmatmul.mubr.bf16.gmra.mxu1 %v1998_v59 }
  0x72   : > { %1582 = vmatprep.mubr.msk.bf16.mxu1 %vm792_vm0, %v2002_v60 }
  0x76   : > { %942 = vmatmul.mubr.bf16.gmra.mxu0 %v2001_v61 }
  0x77   : > { %949 = vmatprep.mubr.bf16.mxu0 %v2005_v62 }
  0x79   : > { %1103 = vmatmul.mubr.bf16.gmra.mxu1 %v2004_v63 }
  0x7a   : > { %1583 = vmatprep.mubr.msk.bf16.mxu1 %vm792_vm0, %v2008_v0 }
  0x7e   : > { %950 = vmatmul.mubr.bf16.gmra.mxu0 %v2007_v1 }
  0x7f   : > { %957 = vmatprep.mubr.bf16.mxu0 %v2011_v2 }
  0x81   : > { %1111 = vmatmul.mubr.bf16.gmra.mxu1 %v2010_v3 }
  0x82   : > { %1584 = vmatprep.mubr.msk.bf16.mxu1 %vm792_vm0, %v2014_v4 }
  0x86   : > { %958 = vmatmul.mubr.bf16.gmra.mxu0 %v2013_v5 }
  0x87   : > { %965 = vmatprep.mubr.bf16.mxu0 %v2017_v6 }
  0x89   : > { %1119 = vmatmul.mubr.bf16.gmra.mxu1 %v2016_v7 }
  0x8a   : > { %1585 = vmatprep.mubr.msk.bf16.mxu1 %vm792_vm0, %v2020_v8 }
  0x8e   : > { %966 = vmatmul.mubr.bf16.gmra.mxu0 %v2019_v9 }
  0x8f   : > { %973 = vmatprep.mubr.bf16.mxu0 %v2023_v10 }
  0x91   : > { %1127 = vmatmul.mubr.bf16.gmra.mxu1 %v2022_v11 }
  0x92   : > { %1586 = vmatprep.mubr.msk.bf16.mxu1 %vm792_vm0, %v2026_v12 }
  0x96   : > { %974 = vmatmul.mubr.bf16.gmra.mxu0 %v2025_v13 }
  0x97   : > { %981 = vmatprep.mubr.bf16.mxu0 %v2029_v14 }
  0x99   : > { %1135 = vmatmul.mubr.bf16.gmra.mxu1 %v2028_v15 }
  0x9a   : > { %1587 = vmatprep.mubr.msk.bf16.mxu1 %vm792_vm0, %v2032_v16 }
  0x9e   : > { %982 = vmatmul.mubr.bf16.gmra.mxu0 %v2031_v17 }
  0x9f   : > { %989 = vmatprep.mubr.bf16.mxu0 %v2035_v18 }
  0xa1   : > { %1143 = vmatmul.mubr.bf16.gmra.mxu1 %v2034_v19 }
  0xa2   : > { %1588 = vmatprep.mubr.msk.bf16.mxu1 %vm792_vm0, %v2038_v20 }
  0xa6   : > { %990 = vmatmul.mubr.bf16.gmra.mxu0 %v2037_v21 }
  0xa7   : > { %997 = vmatprep.mubr.bf16.mxu0 %v2041_v22 }
  0xa9   : > { %1151 = vmatmul.mubr.bf16.gmra.mxu1 %v2040_v23 }
  0xaa   : > { %1589 = vmatprep.mubr.msk.bf16.mxu1 %vm792_vm0, %v2044_v24 }
  0xae   : > { %998 = vmatmul.mubr.bf16.gmra.mxu0 %v2043_v25 }
  0xb1   : > { %1159 = vmatmul.mubr.bf16.gmra.mxu1 %v2046_v26 }
  0xf6   : > { %v1772_v27 = vpop.f32.mrf.mxu0 }
  0xf8   : > { %v1773_v28 = vpop.f32.mrf.mxu0 }
  0xf9   : > { %v1774_v30 = vadd.f32 %v1773_v28, %v1772_v27  ;;  %v1040_v31 = vpop.f32.mrf.mxu1 }
  0xfa   : > { %v1775_v32 = vpop.f32.mrf.mxu0 }
  0xfb   : > { %v880_v33 = vadd.f32 %v1774_v30, %v2377_v29  ;;  %v1042_v34 = vpop.f32.mrf.mxu1 }
  0xfc   : > { %v1776_v35 = vpop.f32.mrf.mxu0 }
  0xfd   : > { %v1777_v36 = vadd.f32 %v1776_v35, %v1775_v32  ;;  %v1043_v37 = vpop.f32.mrf.mxu1  ;;  %v1041_v39 = vadd.f32 %v1040_v31, %v880_v33 }
  0xfe   : > { %v1778_v38 = vpop.f32.mrf.mxu0 }
  0xff   : > { %v883_v40 = vadd.f32 %v1777_v36, %v2377_v29  ;;  %v1045_v41 = vpop.f32.mrf.mxu1  ;;  %v1167_v47 = vmax.f32 %v1041_v39, 0.0 }
 0x100   : > { %v1779_v42 = vpop.f32.mrf.mxu0 }
 0x101   : > { %v1044_v43 = vadd.f32 %v1043_v37, %v883_v40  ;;  %v1780_v44 = vadd.f32 %v1779_v42, %v1778_v38  ;;  %v1048_v45 = vpop.f32.mrf.mxu1 }
 0x102   : > { %v1781_v46 = vpop.f32.mrf.mxu0 }
 0x103   : > { %v1168_v48 = vmax.f32 %v1044_v43, 0.0  ;;  %v888_v49 = vadd.f32 %v1780_v44, %v2377_v29  ;;  %v1050_v50 = vpop.f32.mrf.mxu1 }
 0x104   : > { %v1782_v51 = vpop.f32.mrf.mxu0 }
 0x105   : > { %v1664_v52 = vpack.c.bf16 %v1168_v48, %v1167_v47  ;;  %v1783_v53 = vadd.f32 %v1782_v51, %v1781_v46  ;;  %v1051_v54 = vpop.f32.mrf.mxu1  ;;  %v1049_v56 = vadd.f32 %v1048_v45, %v888_v49 }
 0x106   : > { %v1784_v55 = vpop.f32.mrf.mxu0 }
 0x107   : > { %1665 = vst [vmem:[%s2385_s8] sm:$0xff] %v1664_v52   ;;  %v891_v57 = vadd.f32 %v1783_v53, %v2377_v29  ;;  %v1053_v58 = vpop.f32.mrf.mxu1  ;;  %v1169_v0 = vmax.f32 %v1049_v56, 0.0 }
 0x108   : > { %v1785_v59 = vpop.f32.mrf.mxu0 }
 0x109   : > { %v1052_v60 = vadd.f32 %v1051_v54, %v891_v57  ;;  %v1786_v61 = vadd.f32 %v1785_v59, %v1784_v55  ;;  %v1056_v62 = vpop.f32.mrf.mxu1 }
 0x10a   : > { %v1787_v63 = vpop.f32.mrf.mxu0 }
 0x10b   : > { %v1170_v1 = vmax.f32 %v1052_v60, 0.0  ;;  %v896_v2 = vadd.f32 %v1786_v61, %v2377_v29  ;;  %v1058_v3 = vpop.f32.mrf.mxu1 }
 0x10c   : > { %v1788_v4 = vpop.f32.mrf.mxu0 }
 0x10d   : > { %v1669_v5 = vpack.c.bf16 %v1170_v1, %v1169_v0  ;;  %v1789_v6 = vadd.f32 %v1788_v4, %v1787_v63  ;;  %v1059_v7 = vpop.f32.mrf.mxu1  ;;  %v1057_v9 = vadd.f32 %v1056_v62, %v896_v2 }
 0x10e   : > { %v1790_v8 = vpop.f32.mrf.mxu0 }
 0x10f   : > { %1741 = vst [vmem:[%s2385_s8 + $0x8] sm:$0xff] %v1669_v5   ;;  %v899_v10 = vadd.f32 %v1789_v6, %v2377_v29  ;;  %v1061_v11 = vpop.f32.mrf.mxu1  ;;  %v1171_v17 = vmax.f32 %v1057_v9, 0.0 }
 0x110   : > { %v1791_v12 = vpop.f32.mrf.mxu0 }
 0x111   : > { %v1060_v13 = vadd.f32 %v1059_v7, %v899_v10  ;;  %v1792_v14 = vadd.f32 %v1791_v12, %v1790_v8  ;;  %v1064_v15 = vpop.f32.mrf.mxu1 }
 0x112   : > { %v1793_v16 = vpop.f32.mrf.mxu0 }
 0x113   : > { %v1172_v18 = vmax.f32 %v1060_v13, 0.0  ;;  %v904_v19 = vadd.f32 %v1792_v14, %v2377_v29  ;;  %v1066_v20 = vpop.f32.mrf.mxu1 }
 0x114   : > { %v1794_v21 = vpop.f32.mrf.mxu0 }
 0x115   : > { %v1674_v22 = vpack.c.bf16 %v1172_v18, %v1171_v17  ;;  %v1795_v23 = vadd.f32 %v1794_v21, %v1793_v16  ;;  %v1067_v24 = vpop.f32.mrf.mxu1  ;;  %v1065_v26 = vadd.f32 %v1064_v15, %v904_v19 }
 0x116   : > { %v1796_v25 = vpop.f32.mrf.mxu0 }
 0x117   : > { %1742 = vst [vmem:[%s2385_s8 + $0x10] sm:$0xff] %v1674_v22   ;;  %v907_v27 = vadd.f32 %v1795_v23, %v2377_v29  ;;  %v1069_v28 = vpop.f32.mrf.mxu1  ;;  %v1173_v35 = vmax.f32 %v1065_v26, 0.0 }
 0x118   : > { %v1797_v30 = vpop.f32.mrf.mxu0 }
 0x119   : > { %v1068_v31 = vadd.f32 %v1067_v24, %v907_v27  ;;  %v1798_v32 = vadd.f32 %v1797_v30, %v1796_v25  ;;  %v1072_v33 = vpop.f32.mrf.mxu1 }
 0x11a   : > { %v1799_v34 = vpop.f32.mrf.mxu0 }
 0x11b   : > { %v1174_v36 = vmax.f32 %v1068_v31, 0.0  ;;  %v912_v37 = vadd.f32 %v1798_v32, %v2377_v29  ;;  %v1074_v38 = vpop.f32.mrf.mxu1 }
 0x11c   : > { %v1800_v39 = vpop.f32.mrf.mxu0 }
 0x11d   : > { %v1679_v40 = vpack.c.bf16 %v1174_v36, %v1173_v35  ;;  %v1801_v41 = vadd.f32 %v1800_v39, %v1799_v34  ;;  %v1075_v42 = vpop.f32.mrf.mxu1  ;;  %v1073_v44 = vadd.f32 %v1072_v33, %v912_v37 }
 0x11e   : > { %v1802_v43 = vpop.f32.mrf.mxu0 }
 0x11f   : > { %1743 = vst [vmem:[%s2385_s8 + $0x18] sm:$0xff] %v1679_v40   ;;  %v915_v45 = vadd.f32 %v1801_v41, %v2377_v29  ;;  %v1077_v46 = vpop.f32.mrf.mxu1  ;;  %v1175_v52 = vmax.f32 %v1073_v44, 0.0 }
 0x120   : > { %v1803_v47 = vpop.f32.mrf.mxu0 }
 0x121   : > { %v1076_v48 = vadd.f32 %v1075_v42, %v915_v45  ;;  %v1804_v49 = vadd.f32 %v1803_v47, %v1802_v43  ;;  %v1080_v50 = vpop.f32.mrf.mxu1 }
 0x122   : > { %v1805_v51 = vpop.f32.mrf.mxu0 }
 0x123   : > { %v1176_v53 = vmax.f32 %v1076_v48, 0.0  ;;  %v920_v54 = vadd.f32 %v1804_v49, %v2377_v29  ;;  %v1082_v55 = vpop.f32.mrf.mxu1 }
 0x124   : > { %v1806_v56 = vpop.f32.mrf.mxu0 }
 0x125   : > { %v1684_v57 = vpack.c.bf16 %v1176_v53, %v1175_v52  ;;  %v1807_v58 = vadd.f32 %v1806_v56, %v1805_v51  ;;  %v1083_v59 = vpop.f32.mrf.mxu1  ;;  %v1081_v61 = vadd.f32 %v1080_v50, %v920_v54 }
 0x126   : > { %v1808_v60 = vpop.f32.mrf.mxu0 }
 0x127   : > { %1744 = vst [vmem:[%s2385_s8 + $0x20] sm:$0xff] %v1684_v57   ;;  %v923_v62 = vadd.f32 %v1807_v58, %v2377_v29  ;;  %v1085_v63 = vpop.f32.mrf.mxu1  ;;  %v1177_v5 = vmax.f32 %v1081_v61, 0.0 }
 0x128   : > { %v1809_v0 = vpop.f32.mrf.mxu0 }
 0x129   : > { %v1084_v1 = vadd.f32 %v1083_v59, %v923_v62  ;;  %v1810_v2 = vadd.f32 %v1809_v0, %v1808_v60  ;;  %v1088_v3 = vpop.f32.mrf.mxu1 }
 0x12a   : > { %v1811_v4 = vpop.f32.mrf.mxu0 }
 0x12b   : > { %v1178_v6 = vmax.f32 %v1084_v1, 0.0  ;;  %v928_v7 = vadd.f32 %v1810_v2, %v2377_v29  ;;  %v1090_v8 = vpop.f32.mrf.mxu1 }
 0x12c   : > { %v1812_v9 = vpop.f32.mrf.mxu0 }
 0x12d   : > { %v1689_v10 = vpack.c.bf16 %v1178_v6, %v1177_v5  ;;  %v1813_v11 = vadd.f32 %v1812_v9, %v1811_v4  ;;  %v1091_v12 = vpop.f32.mrf.mxu1  ;;  %v1089_v14 = vadd.f32 %v1088_v3, %v928_v7 }
 0x12e   : > { %v1814_v13 = vpop.f32.mrf.mxu0 }
 0x12f   : > { %1745 = vst [vmem:[%s2385_s8 + $0x28] sm:$0xff] %v1689_v10   ;;  %v931_v15 = vadd.f32 %v1813_v11, %v2377_v29  ;;  %v1093_v16 = vpop.f32.mrf.mxu1  ;;  %v1179_v22 = vmax.f32 %v1089_v14, 0.0 }
 0x130   : > { %v1815_v17 = vpop.f32.mrf.mxu0 }
 0x131   : > { %v1092_v18 = vadd.f32 %v1091_v12, %v931_v15  ;;  %v1816_v19 = vadd.f32 %v1815_v17, %v1814_v13  ;;  %v1096_v20 = vpop.f32.mrf.mxu1 }
 0x132   : > { %v1817_v21 = vpop.f32.mrf.mxu0 }
 0x133   : > { %v1180_v23 = vmax.f32 %v1092_v18, 0.0  ;;  %v936_v24 = vadd.f32 %v1816_v19, %v2377_v29  ;;  %v1098_v25 = vpop.f32.mrf.mxu1 }
 0x134   : > { %v1818_v26 = vpop.f32.mrf.mxu0 }
 0x135   : > { %v1694_v27 = vpack.c.bf16 %v1180_v23, %v1179_v22  ;;  %v1819_v28 = vadd.f32 %v1818_v26, %v1817_v21  ;;  %v1099_v30 = vpop.f32.mrf.mxu1  ;;  %v1097_v32 = vadd.f32 %v1096_v20, %v936_v24 }
 0x136   : > { %v1820_v31 = vpop.f32.mrf.mxu0 }
 0x137   : > { %1746 = vst [vmem:[%s2385_s8 + $0x30] sm:$0xff] %v1694_v27   ;;  %v939_v33 = vadd.f32 %v1819_v28, %v2377_v29  ;;  %v1101_v34 = vpop.f32.mrf.mxu1  ;;  %v1181_v40 = vmax.f32 %v1097_v32, 0.0 }
 0x138   : > { %v1821_v35 = vpop.f32.mrf.mxu0 }
 0x139   : > { %v1100_v36 = vadd.f32 %v1099_v30, %v939_v33  ;;  %v1822_v37 = vadd.f32 %v1821_v35, %v1820_v31  ;;  %v1104_v38 = vpop.f32.mrf.mxu1 }
 0x13a   : > { %v1823_v39 = vpop.f32.mrf.mxu0 }
 0x13b   : > { %v1182_v41 = vmax.f32 %v1100_v36, 0.0  ;;  %v944_v42 = vadd.f32 %v1822_v37, %v2377_v29  ;;  %v1106_v43 = vpop.f32.mrf.mxu1 }
 0x13c   : > { %v1824_v44 = vpop.f32.mrf.mxu0 }
 0x13d   : > { %v1699_v45 = vpack.c.bf16 %v1182_v41, %v1181_v40  ;;  %v1825_v46 = vadd.f32 %v1824_v44, %v1823_v39  ;;  %v1107_v47 = vpop.f32.mrf.mxu1  ;;  %v1105_v49 = vadd.f32 %v1104_v38, %v944_v42 }
 0x13e   : > { %v1826_v48 = vpop.f32.mrf.mxu0 }
 0x13f   : > { %1747 = vst [vmem:[%s2385_s8 + $0x38] sm:$0xff] %v1699_v45   ;;  %v947_v50 = vadd.f32 %v1825_v46, %v2377_v29  ;;  %v1109_v51 = vpop.f32.mrf.mxu1  ;;  %v1183_v57 = vmax.f32 %v1105_v49, 0.0 }
 0x140   : > { %v1827_v52 = vpop.f32.mrf.mxu0 }
 0x141   : > { %v1108_v53 = vadd.f32 %v1107_v47, %v947_v50  ;;  %v1828_v54 = vadd.f32 %v1827_v52, %v1826_v48  ;;  %v1112_v55 = vpop.f32.mrf.mxu1 }
 0x142   : > { %v1829_v56 = vpop.f32.mrf.mxu0 }
 0x143   : > { %v1184_v58 = vmax.f32 %v1108_v53, 0.0  ;;  %v952_v59 = vadd.f32 %v1828_v54, %v2377_v29  ;;  %v1114_v60 = vpop.f32.mrf.mxu1 }
 0x144   : > { %v1830_v61 = vpop.f32.mrf.mxu0 }
 0x145   : > { %v1704_v62 = vpack.c.bf16 %v1184_v58, %v1183_v57  ;;  %v1831_v63 = vadd.f32 %v1830_v61, %v1829_v56  ;;  %v1115_v0 = vpop.f32.mrf.mxu1  ;;  %v1113_v2 = vadd.f32 %v1112_v55, %v952_v59 }
 0x146   : > { %v1832_v1 = vpop.f32.mrf.mxu0 }
 0x147   : > { %1748 = vst [vmem:[%s2385_s8 + $0x40] sm:$0xff] %v1704_v62   ;;  %v955_v3 = vadd.f32 %v1831_v63, %v2377_v29  ;;  %v1117_v4 = vpop.f32.mrf.mxu1  ;;  %v1185_v10 = vmax.f32 %v1113_v2, 0.0 }
 0x148   : > { %v1833_v5 = vpop.f32.mrf.mxu0 }
 0x149   : > { %v1116_v6 = vadd.f32 %v1115_v0, %v955_v3  ;;  %v1834_v7 = vadd.f32 %v1833_v5, %v1832_v1  ;;  %v1120_v8 = vpop.f32.mrf.mxu1 }
 0x14a   : > { %v1835_v9 = vpop.f32.mrf.mxu0 }
 0x14b   : > { %v1186_v11 = vmax.f32 %v1116_v6, 0.0  ;;  %v960_v12 = vadd.f32 %v1834_v7, %v2377_v29  ;;  %v1122_v13 = vpop.f32.mrf.mxu1 }
 0x14c   : > { %v1836_v14 = vpop.f32.mrf.mxu0 }
 0x14d   : > { %v1709_v15 = vpack.c.bf16 %v1186_v11, %v1185_v10  ;;  %v1837_v16 = vadd.f32 %v1836_v14, %v1835_v9  ;;  %v1123_v17 = vpop.f32.mrf.mxu1  ;;  %v1121_v19 = vadd.f32 %v1120_v8, %v960_v12 }
 0x14e   : > { %v1838_v18 = vpop.f32.mrf.mxu0 }
 0x14f   : > { %1749 = vst [vmem:[%s2385_s8 + $0x48] sm:$0xff] %v1709_v15   ;;  %v963_v20 = vadd.f32 %v1837_v16, %v2377_v29  ;;  %v1125_v21 = vpop.f32.mrf.mxu1  ;;  %v1187_v27 = vmax.f32 %v1121_v19, 0.0 }
 0x150   : > { %v1839_v22 = vpop.f32.mrf.mxu0 }
 0x151   : > { %v1124_v23 = vadd.f32 %v1123_v17, %v963_v20  ;;  %v1840_v24 = vadd.f32 %v1839_v22, %v1838_v18  ;;  %v1128_v25 = vpop.f32.mrf.mxu1 }
 0x152   : > { %v1841_v26 = vpop.f32.mrf.mxu0 }
 0x153   : > { %v1188_v28 = vmax.f32 %v1124_v23, 0.0  ;;  %v968_v30 = vadd.f32 %v1840_v24, %v2377_v29  ;;  %v1130_v31 = vpop.f32.mrf.mxu1 }
 0x154   : > { %v1842_v32 = vpop.f32.mrf.mxu0 }
 0x155   : > { %v1714_v33 = vpack.c.bf16 %v1188_v28, %v1187_v27  ;;  %v1843_v34 = vadd.f32 %v1842_v32, %v1841_v26  ;;  %v1131_v35 = vpop.f32.mrf.mxu1  ;;  %v1129_v37 = vadd.f32 %v1128_v25, %v968_v30 }
 0x156   : > { %v1844_v36 = vpop.f32.mrf.mxu0 }
 0x157   : > { %1750 = vst [vmem:[%s2385_s8 + $0x50] sm:$0xff] %v1714_v33   ;;  %v971_v38 = vadd.f32 %v1843_v34, %v2377_v29  ;;  %v1133_v39 = vpop.f32.mrf.mxu1  ;;  %v1189_v45 = vmax.f32 %v1129_v37, 0.0 }
 0x158   : > { %v1845_v40 = vpop.f32.mrf.mxu0 }
 0x159   : > { %v1132_v41 = vadd.f32 %v1131_v35, %v971_v38  ;;  %v1846_v42 = vadd.f32 %v1845_v40, %v1844_v36  ;;  %v1136_v43 = vpop.f32.mrf.mxu1 }
 0x15a   : > { %v1847_v44 = vpop.f32.mrf.mxu0 }
 0x15b   : > { %v1190_v46 = vmax.f32 %v1132_v41, 0.0  ;;  %v976_v47 = vadd.f32 %v1846_v42, %v2377_v29  ;;  %v1138_v48 = vpop.f32.mrf.mxu1 }
 0x15c   : > { %v1848_v49 = vpop.f32.mrf.mxu0 }
 0x15d   : > { %v1719_v50 = vpack.c.bf16 %v1190_v46, %v1189_v45  ;;  %v1849_v51 = vadd.f32 %v1848_v49, %v1847_v44  ;;  %v1139_v52 = vpop.f32.mrf.mxu1  ;;  %v1137_v54 = vadd.f32 %v1136_v43, %v976_v47 }
 0x15e   : > { %v1850_v53 = vpop.f32.mrf.mxu0 }
 0x15f   : > { %1751 = vst [vmem:[%s2385_s8 + $0x58] sm:$0xff] %v1719_v50   ;;  %v979_v55 = vadd.f32 %v1849_v51, %v2377_v29  ;;  %v1141_v56 = vpop.f32.mrf.mxu1  ;;  %v1191_v62 = vmax.f32 %v1137_v54, 0.0 }
 0x160   : > { %v1851_v57 = vpop.f32.mrf.mxu0 }
 0x161   : > { %v1140_v58 = vadd.f32 %v1139_v52, %v979_v55  ;;  %v1852_v59 = vadd.f32 %v1851_v57, %v1850_v53  ;;  %v1144_v60 = vpop.f32.mrf.mxu1 }
 0x162   : > { %v1853_v61 = vpop.f32.mrf.mxu0 }
 0x163   : > { %v1192_v63 = vmax.f32 %v1140_v58, 0.0  ;;  %v984_v0 = vadd.f32 %v1852_v59, %v2377_v29  ;;  %v1146_v1 = vpop.f32.mrf.mxu1 }
 0x164   : > { %v1854_v2 = vpop.f32.mrf.mxu0 }
 0x165   : > { %v1724_v3 = vpack.c.bf16 %v1192_v63, %v1191_v62  ;;  %v1855_v4 = vadd.f32 %v1854_v2, %v1853_v61  ;;  %v1147_v5 = vpop.f32.mrf.mxu1  ;;  %v1145_v7 = vadd.f32 %v1144_v60, %v984_v0 }
 0x166   : > { %v1856_v6 = vpop.f32.mrf.mxu0 }
 0x167   : > { %1752 = vst [vmem:[%s2385_s8 + $0x60] sm:$0xff] %v1724_v3   ;;  %v987_v8 = vadd.f32 %v1855_v4, %v2377_v29  ;;  %v1149_v9 = vpop.f32.mrf.mxu1  ;;  %v1193_v15 = vmax.f32 %v1145_v7, 0.0 }
 0x168   : > { %v1857_v10 = vpop.f32.mrf.mxu0 }
 0x169   : > { %v1148_v11 = vadd.f32 %v1147_v5, %v987_v8  ;;  %v1858_v12 = vadd.f32 %v1857_v10, %v1856_v6  ;;  %v1152_v13 = vpop.f32.mrf.mxu1 }
 0x16a   : > { %v1859_v14 = vpop.f32.mrf.mxu0 }
 0x16b   : > { %v1194_v16 = vmax.f32 %v1148_v11, 0.0  ;;  %v992_v17 = vadd.f32 %v1858_v12, %v2377_v29  ;;  %v1154_v18 = vpop.f32.mrf.mxu1 }
 0x16c   : > { %v1860_v19 = vpop.f32.mrf.mxu0 }
 0x16d   : > { %v1729_v20 = vpack.c.bf16 %v1194_v16, %v1193_v15  ;;  %v1861_v21 = vadd.f32 %v1860_v19, %v1859_v14  ;;  %v1155_v22 = vpop.f32.mrf.mxu1  ;;  %v1153_v24 = vadd.f32 %v1152_v13, %v992_v17 }
 0x16e   : > { %v1862_v23 = vpop.f32.mrf.mxu0 }
 0x16f   : > { %1753 = vst [vmem:[%s2385_s8 + $0x68] sm:$0xff] %v1729_v20   ;;  %v995_v25 = vadd.f32 %v1861_v21, %v2377_v29  ;;  %v1157_v26 = vpop.f32.mrf.mxu1  ;;  %v1195_v33 = vmax.f32 %v1153_v24, 0.0 }
 0x170   : > { %v1863_v27 = vpop.f32.mrf.mxu0 }
 0x171   : > { %v1156_v28 = vadd.f32 %v1155_v22, %v995_v25  ;;  %v1864_v30 = vadd.f32 %v1863_v27, %v1862_v23  ;;  %v1160_v31 = vpop.f32.mrf.mxu1 }
 0x172   : > { %v1865_v32 = vpop.f32.mrf.mxu0 }
 0x173   : > { %v1196_v34 = vmax.f32 %v1156_v28, 0.0  ;;  %v1000_v35 = vadd.f32 %v1864_v30, %v2377_v29  ;;  %v1162_v36 = vpop.f32.mrf.mxu1 }
 0x174   : > { %v1866_v37 = vpop.f32.mrf.mxu0 }
 0x175   : > { %v1734_v38 = vpack.c.bf16 %v1196_v34, %v1195_v33  ;;  %v1867_v39 = vadd.f32 %v1866_v37, %v1865_v32  ;;  %v1163_v40 = vpop.f32.mrf.mxu1  ;;  %v1161_v41 = vadd.f32 %v1160_v31, %v1000_v35 }
 0x177   : > { %1754 = vst [vmem:[%s2385_s8 + $0x70] sm:$0xff] %v1734_v38   ;;  %v1003_v42 = vadd.f32 %v1867_v39, %v2377_v29  ;;  %v1165_v43 = vpop.f32.mrf.mxu1  ;;  %v1197_v45 = vmax.f32 %v1161_v41, 0.0 }
 0x179   : > { %v1164_v44 = vadd.f32 %v1163_v40, %v1003_v42 }
 0x17b   : > { %v1198_v46 = vmax.f32 %v1164_v44, 0.0 }
 0x17d   : > { %v1739_v47 = vpack.c.bf16 %v1198_v46, %v1197_v45 }
 0x17f   : > { %1755 = vst [vmem:[%s2385_s8 + $0x78] sm:$0xff] %v1739_v47  }
 0x180   : > { %2060 = shalt.err (!%p2057_p5)
}
 0x181   : > { %s2061_s28 = scalar_lea.hbm %s2436_s18, 2048  ;;  %s2065_s4 = scalar_lea.hbm %s2491_s3, 16384 }
 0x182   : > { %p2062_p6 = scmp.ne.s32.totalorder %s2436_s18, %s2061_s28  ;;  %p2066_p10 = scmp.lt.s32.totalorder %s2436_s18, %s2491_s3 }
 0x183   : > { %p2067_p11 = scmp.lt.s32.totalorder %s2065_s4, %s2061_s28 }
 0x184   : > { %p2063_p7 = pnand %p2062_p6, %p2189_p4 }
 0x185   : > { %p2068_p12 = por %p2067_p11, %p2066_p10 }
 0x186   : > { %p2064_p9 = pneg %p2063_p7 }
 0x188   : > { %p2069_p13 = pnand %p2068_p12, %p2064_p9 }
 0x18a   : > { %2072 = shalt.err (!%p2069_p13)
}
 0x18b   : > { %s2127_s7 = smov 64   ;;  %s2128_s8 = smov 4  }
 0x18c   : > { %1868 = dma.vmem_to_hbm [thread:$0]  (%p2189_p4), %s2438_s9, 2048, %s2436_s18, %s2443_s19, %s2127_s7, %s2127_s7, %s2128_s8  }
 0x18d PF: > { %p1874_p0 = scmp.ge.s32.totalorder %s2123_s17, 2  ;;  %s1389_s27 = sand.u32 1, %s2103_s12  }
 0x18e   : > { %s1390_s10 = scalar_lea.sflag [#allocation3], %s1389_s27 }
 0x18f   : > { %p1871_p1 = pnand %p1874_p0, %p2196_p8 }
 0x191   : > { %p1872_p2 = pneg %p1871_p1 }
 0x193   : > { %2098 = dma.done.wait (%p1872_p2), %s1390_s10, 2048  }
 0x194   : > { %2100 = vsyncadd (%p1872_p2), %s1390_s10, 4294965248  ;;  %s16_s17 = sadd.s32 1, %s2123_s17   ;;  %s2494_s12 = smov %s2107_s13 }
 0x195   : > { %p13_p3 = scmp.ge.s32.totalorder %s16_s17, 10   ;;  %s2495_s13 = smov %s2111_s14 }
 0x196   : > { %s2496_s14 = smov %s2202_s25  ;;  %s2497_s15 = smov %s2119_s16 }
 0x197   : > { %s2498_s16 = smov %s2500_s20  ;;  %15 = sbr.rel (!%p13_p3) target bundleno = 4 (0x4), region = 73 }
 0x19c   :  { %1395 = vsyncpa [#allocation3], 1 }
 0x19d   :  { %1397 = vsyncpa [#allocation3 + $0x1], 1 }

</bundles_post_ra>
